<compile_context>
chip_gen: v6e
topology: v6e:2x2x1
jax: 0.10.0
libtpu: 0.0.40
codegen_flags: <defaults>
</compile_context>

<pallas_src>
import functools

import jax
import jax.numpy as jnp
from jax.experimental import pallas as pl
from jax.experimental.pallas import tpu as pltpu

_LANE = 128


def _t5_layernorm_kernel(x_ref, w_ref, o_ref, *, eps, inv_hidden):
    # x_ref: (tile_rows, hidden_p)  input tile
    # w_ref: (1, hidden_p)          weight row (resident across the grid)
    # o_ref: (tile_rows, hidden_p)  output tile
    #
    # Cast from x_ref separately in the variance and the normalize expressions
    # so no full-tile f32 temp must survive the reduction (extra cast is a
    # nearly-free VPU op on a mem-bound kernel).
    xs = x_ref[...].astype(jnp.float32)
    # sum * (1/true_hidden) instead of mean: zero lane padding never changes it.
    variance = jnp.sum(xs * xs, axis=-1, keepdims=True) * inv_hidden
    inv = jax.lax.rsqrt(variance + eps)
    w_f32 = w_ref[...].astype(jnp.float32)
    o_ref[...] = (w_f32 * (x_ref[...].astype(jnp.float32) * inv)).astype(o_ref.dtype)


def _round_up(n, m):
    return ((n + m - 1) // m) * m


def _vmem_capacity_bytes():
    """Physical VMEM per TensorCore; generation-aware with safe fallbacks."""
    try:
        return int(pltpu.get_tpu_info().vmem_capacity_bytes)
    except Exception:
        pass
    try:
        kind = jax.devices()[0].device_kind.lower()
        if "v7" in kind or "tpu7" in kind:
            return 64 * 1024 * 1024           # v7x: 64 MiB per TensorCore
    except Exception:
        pass
    return 128 * 1024 * 1024                  # v5e / v6e


def _is_v7x():
    try:
        kind = jax.devices()[0].device_kind.lower()
        return "v7" in kind or "tpu7" in kind
    except Exception:
        return False


def t5_layer_norm(hidden_states, weight, eps=1e-6, *, tile_rows=None,
                  out_dtype=None, vmem_limit_bytes=None):
    """T5/RMS layer norm. hidden_states: (..., hidden); weight: (hidden,).

    Default out_dtype follows PyTorch promotion (the spec module always ends
    up in f32 because rsqrt(variance) is f32); pass out_dtype=jnp.bfloat16 to
    halve writeback traffic when strict promotion is not required.
    """
    orig_shape = hidden_states.shape
    hidden = orig_shape[-1]
    x2d = hidden_states.reshape(-1, hidden)
    rows = x2d.shape[0]

    if out_dtype is None:
        # PyTorch: x * rsqrt(f32 variance) -> f32; weight * f32 -> f32.
        out_dtype = jnp.promote_types(
            jnp.promote_types(hidden_states.dtype, weight.dtype), jnp.float32)
    out_dtype = jnp.dtype(out_dtype)

    # Lane-dense last dim: pad hidden to a multiple of 128 so every store is an
    # unmasked vst. Real LLM hidden sizes already satisfy this (no-pad path).
    hidden_p = _round_up(hidden, _LANE)
    w = weight
    if hidden_p != hidden:
        x2d = jnp.pad(x2d, ((0, 0), (0, hidden_p - hidden)))
        w = jnp.pad(weight, (0, hidden_p - hidden))

    in_bytes = jnp.dtype(x2d.dtype).itemsize
    out_bytes = out_dtype.itemsize
    w_bytes = jnp.dtype(w.dtype).itemsize

    # Packed-sublane multiple for the narrowest dtype touching this block:
    # f32 -> 8, bf16/f16 -> 16, 8-bit -> 32.
    sub_mult = max(32 // min(in_bytes, out_bytes), 8)

    vmem_cap = _vmem_capacity_bytes()
    if vmem_limit_bytes is None:
        vmem_limit_bytes = min(int(vmem_cap * 0.75), 100 * 1024 * 1024)

    if tile_rows is None:
        # Tiles + temps capped at ~50% of physical VMEM: leaves room for the
        # resident weight buffers, semaphores and compiler scratch on both the
        # 128 MiB (v5e/v6e) and 64 MiB-per-TC (v7x) parts.
        tile_budget = int(vmem_cap * 0.5) - 2 * hidden_p * w_bytes
        # Per row: double-buffered input + output tiles, plus one full-width
        # f32 temporary in case the two x_ref casts get CSE'd back together.
        per_row = hidden_p * (2 * in_bytes + 2 * out_bytes + 4)
        tile_rows = min(max(tile_budget // per_row, sub_mult), 4096)
    tile_rows = max((tile_rows // sub_mult) * sub_mult, sub_mult)
    # Never use a block taller than the (sublane-rounded) row count.
    tile_rows = min(tile_rows, _round_up(rows, sub_mult))

    # No host-side row padding: a partial last block is fine because the
    # reduction is strictly per-row; out-of-bounds rows never touch valid rows.
    grid = (pl.cdiv(rows, tile_rows),)

    # v7x: split the row stream across the two TensorCores (each drives its own
    # DMA stream / VMEM); plain "parallel" keeps portability on v5e/v6e.
    row_sem = "parallel"
    if _is_v7x() and hasattr(pltpu, "CORE_PARALLEL") and grid[0] >= 2:
        row_sem = pltpu.CORE_PARALLEL

    w2d = w.reshape(1, hidden_p)
    kernel = functools.partial(_t5_layernorm_kernel, eps=eps,
                               inv_hidden=1.0 / float(hidden))

    out = pl.pallas_call(
        kernel,
        out_shape=jax.ShapeDtypeStruct((rows, hidden_p), out_dtype),
        grid_spec=pltpu.PrefetchScalarGridSpec(
            num_scalar_prefetch=0,
            grid=grid,
            in_specs=[
                pl.BlockSpec((tile_rows, hidden_p), lambda i: (i, 0)),
                pl.BlockSpec((1, hidden_p), lambda i: (0, 0)),
            ],
            out_specs=pl.BlockSpec((tile_rows, hidden_p), lambda i: (i, 0)),
        ),
        compiler_params=pltpu.CompilerParams(
            dimension_semantics=(row_sem,),
            vmem_limit_bytes=vmem_limit_bytes,
        ),
    )(x2d, w2d)

    if hidden_p != hidden:
        out = out[:, :hidden]
    return out.reshape(orig_shape)


if __name__ == "__main__":
    key = jax.random.PRNGKey(0)
    batch, seq, hidden = 2, 8, 32  # demo-sized; real LLM hidden is lane-dense

    x = jax.random.normal(key, (batch, seq, hidden), dtype=jnp.float32)
    # Module __init__: weight = ones(hidden_size)
    weight = jnp.ones((hidden,), dtype=jnp.float32)
    eps = 1e-6

    out = t5_layer_norm(x, weight, eps)
    out = jax.block_until_ready(out)

    # Reference (pure JAX, same math as the PyTorch forward)
    var = jnp.mean(x.astype(jnp.float32) ** 2, axis=-1, keepdims=True)
    ref = weight * (x * jax.lax.rsqrt(var + eps))
    assert out.shape == x.shape
    assert out.dtype == ref.dtype
    assert jnp.allclose(out, ref, atol=1e-5, rtol=1e-5)

    print("KERNEL_OK")
</pallas_src>

<mosaic_0001>
module attributes {stable_mosaic.version = 11 : i64} {
  func.func @_t5_layernorm_kernel(%arg0: i32, %arg1: memref<16x128xf32, #tpu.memory_space<vmem>>, %arg2: memref<1x128xf32, #tpu.memory_space<vmem>>, %arg3: memref<16x128xf32, #tpu.memory_space<vmem>>) attributes {dimension_semantics = [#tpu.dimension_semantics<parallel>], iteration_bounds = array<i64: 1>, scalar_prefetch = 0 : i64, scratch_operands = 0 : i64, tpu.core_type = #tpu.core_type<tc>, window_params = [{transform_indices = @transform_0, window_bounds = array<i64: 16, 128>}, {pipeline_mode = #tpu.pipeline_mode<synchronous>, transform_indices = @transform_1, window_bounds = array<i64: 1, 128>}, {transform_indices = @transform_2, window_bounds = array<i64: 16, 128>}]} {
    %c0 = arith.constant 0 : index
    %c0_0 = arith.constant 0 : index
    %0 = vector.load %arg1[%c0, %c0_0] : memref<16x128xf32, #tpu.memory_space<vmem>>, vector<16x128xf32>
    %1 = arith.mulf %0, %0 : vector<16x128xf32>
    %cst = arith.constant dense<0.000000e+00> : vector<16xf32>
    %2 = vector.multi_reduction <add>, %1, %cst [1] : vector<16x128xf32> to vector<16xf32>
    %3 = vector.shape_cast %2 : vector<16xf32> to vector<16x1xf32>
    %cst_1 = arith.constant 3.125000e-02 : f32
    %4 = vector.broadcast %cst_1 : f32 to vector<16x1xf32>
    %5 = arith.mulf %3, %4 : vector<16x1xf32>
    %cst_2 = arith.constant 9.99999997E-7 : f32
    %6 = vector.broadcast %cst_2 : f32 to vector<16x1xf32>
    %7 = arith.addf %5, %6 : vector<16x1xf32>
    %8 = math.rsqrt %7 : vector<16x1xf32>
    %c0_3 = arith.constant 0 : index
    %c0_4 = arith.constant 0 : index
    %9 = vector.load %arg2[%c0_3, %c0_4] : memref<1x128xf32, #tpu.memory_space<vmem>>, vector<1x128xf32>
    %c0_5 = arith.constant 0 : index
    %c0_6 = arith.constant 0 : index
    %10 = vector.load %arg1[%c0_5, %c0_6] : memref<16x128xf32, #tpu.memory_space<vmem>>, vector<16x128xf32>
    %11 = vector.broadcast %8 : vector<16x1xf32> to vector<16x128xf32>
    %12 = arith.mulf %10, %11 : vector<16x128xf32>
    %13 = vector.broadcast %9 : vector<1x128xf32> to vector<16x128xf32>
    %14 = arith.mulf %13, %12 : vector<16x128xf32>
    %c0_7 = arith.constant 0 : index
    %c0_8 = arith.constant 0 : index
    %15 = vector.load %arg3[%c0_7, %c0_8] : memref<16x128xf32, #tpu.memory_space<vmem>>, vector<16x128xf32>
    tpu.vector_store %arg3[%c0_7, %c0_8], %14 {strides = array<i32>} : memref<16x128xf32, #tpu.memory_space<vmem>>, vector<16x128xf32>,
    return
  }
  func.func @transform_0(%arg0: i32) -> (i32, i32) {
    %c0_i32 = arith.constant 0 : i32
    %c0_i32_0 = arith.constant 0 : i32
    return %arg0, %c0_i32 : i32, i32
  }
  func.func @transform_1(%arg0: i32) -> (i32, i32) {
    %c0_i32 = arith.constant 0 : i32
    %c0_i32_0 = arith.constant 0 : i32
    %c0_i32_1 = arith.constant 0 : i32
    return %c0_i32, %c0_i32_0 : i32, i32
  }
  func.func @transform_2(%arg0: i32) -> (i32, i32) {
    %c0_i32 = arith.constant 0 : i32
    %c0_i32_0 = arith.constant 0 : i32
    return %arg0, %c0_i32 : i32, i32
  }
}

</mosaic_0001>

<bundles_post_ra>
// kernel: tpu_custom_call.1
= control target key start
LH: loop header
LB: loop body
LE: loop exit
PB: predicated region body
PF: predicated region fallthrough
CT: control target
= control target key end

     0   :  { %7 = vsyncpa [#allocation3], 0  ;;  %s157_s0 = inlined_call_operand.hbm [shape: f32[16,128], index: 0, kind: input, shape index: {}]   ;;  %s158_s1 = inlined_call_operand.vmem [shape: f32[1,128], index: 1, kind: input, shape index: {}]   ;;  %s159_s2 = inlined_call_operand.hbm [shape: f32[16,128], index: 2, kind: output, shape index: {}]  }
   0x1   :  { %8 = vsyncpa [#allocation4], 0  ;;  %s123_s9 = smov [#allocation2]  }
   0x2   :  { %s14_s10 = sshll.u32 %s123_s9, 4  ;;  %s15_s10 = int_to_ptr.vmem [resolvable:$true] %s14_s10 }
   0x3   :  { %s87_s11 = scalar_lea.vmem %s15_s10, 256  ;;  %p92_p1 = scmp.lt.s32.totalorder %s15_s10, %s15_s10 }
   0x4   :  { %p88_p0 = scmp.ne.s32.totalorder %s15_s10, %s87_s11  ;;  %p93_p2 = scmp.lt.s32.totalorder %s87_s11, %s87_s11 }
   0x6   :  { %p94_p3 = por %p93_p2, %p92_p1 }
   0x8   :  { %p95_p4 = pnand %p94_p3, %p88_p0 }
   0xa   :  { %98 = shalt.err (!%p95_p4)
}
   0xb   :  { %s124_s12 = smov 128   ;;  %s125_s13 = smov 8  }
   0xc   :  { %20 = dma.hbm_to_vmem [thread:$0]  %s157_s0, 256, %s15_s10, [#allocation3], %s124_s12, %s124_s12, %s125_s13  }
   0xd   :  { %119 = dma.done.wait [#allocation3], 256  }
   0xe   :  { %120 = vsyncadd [#allocation3], 4294967040  ;;  %v26_v0 = vld [vmem:[#allocation2] sm:$0xff]  ;;  %v27_v1 = vld [vmem:[#allocation2 + $0x8] sm:$0xff]  ;;  %s126_s0 = smov [#allocation5]  }
   0xf   :  { %v28_v2 = vmul.f32 %v26_v0, %v26_v0  ;;  %v29_v3 = vmul.f32 %v27_v1, %v27_v1  ;;  %v70_v11 = vld [vmem:[%s158_s1] ss:$0 sm:$0xff]  ;;  %s58_s18 = sshll.u32 %s126_s0, 4  ;;  %s59_s18 = int_to_ptr.vmem [resolvable:$true] %s58_s18 }
  0x10   :  { %s99_s19 = scalar_lea.vmem %s59_s18, 256  ;;  %p104_p6 = scmp.lt.s32.totalorder %s59_s18, %s59_s18 }
  0x11   :  { %30 = vadd.xlane.f32.xlu0 %v28_v2  ;;  %p100_p5 = scmp.ne.s32.totalorder %s59_s18, %s99_s19  ;;  %p105_p7 = scmp.lt.s32.totalorder %s99_s19, %s99_s19 }
  0x13   :  { %p106_p8 = por %p105_p7, %p104_p6 }
  0x15   :  { %32 = vadd.xlane.f32.xlu0 %v29_v3  ;;  %p107_p9 = pnand %p106_p8, %p100_p5 }
  0x9a   :  { %v31_v4 = vpop.xlane.xlu0 %30 }
  0x9b   :  { %v34_v5 = vmul.f32 0.03125, %v31_v4 }
  0x9d   :  { %v36_v6 = vadd.f32 1e-06, %v34_v5 }
  0x9e   :  { %v33_v7 = vpop.xlane.xlu0 %32 }
  0x9f   :  { %75 = vrsqrt.f32 %v36_v6  ;;  %v35_v8 = vmul.f32 0.03125, %v33_v7 }
  0xa1   :  { %v37_v9 = vadd.f32 1e-06, %v35_v8 }
  0xa3   :  { %77 = vrsqrt.f32 %v37_v9 }
  0xac   :  { %v76_v10 = vpop.eup %75 }
  0xad   :  { %v41_v12 = vmul.f32 %v76_v10, %v26_v0 }
  0xaf   :  { %v49_v13 = vmul.f32 %v70_v11, %v41_v12 }
  0xb0   :  { %v78_v14 = vpop.eup %77 }
  0xb1   :  { %v42_v15 = vmul.f32 %v78_v14, %v27_v1  ;;  %51 = vst [vmem:[#allocation5] sm:$0xff] %v49_v13 }
  0xb3   :  { %v50_v16 = vmul.f32 %v70_v11, %v42_v15 }
  0xb5   :  { %52 = vst [vmem:[#allocation5 + $0x8] sm:$0xff] %v50_v16 }
  0xb6   :  { %110 = shalt.err (!%p107_p9)
}
  0xb7   :  { %64 = dma.vmem_to_hbm [thread:$0]  %s59_s18, 256, %s159_s2, [#allocation4], %s124_s12, %s124_s12, %s125_s13  }
  0xb8   :  { %121 = dma.done.wait [#allocation4], 256  }
  0xb9   :  { %122 = vsyncadd [#allocation4], 4294967040 }
  0xba   :  { %68 = vsyncpa [#allocation3], 1 }
  0xbb   :  { %69 = vsyncpa [#allocation4], 1 }

</bundles_post_ra>
